<compile_context>
chip_gen: v7x
topology: tpu7x:2x2x1
jax: 0.10.0
libtpu: 0.0.40
codegen_flags: <defaults>
</compile_context>

<pallas_src>
import math

import jax
import jax.numpy as jnp
from jax.experimental import pallas as pl
from jax.experimental.pallas import tpu as pltpu

_LANE = 1024                    # generic slab width: 8 sublanes * 128 lanes
_TARGET_BLOCK_BYTES = 1 << 20   # ~1 MiB per f32 operand block (85%+ of HBM roofline)
_TWO_PI = 2.0 * math.pi


def _bits_to_unit_float(bits):
    """Raw 32-bit random words -> f32 uniform in [1.0, 2.0) via the mantissa."""
    return pltpu.bitcast((bits & 0x007FFFFF) | 0x3F800000, jnp.float32)


def _gaussian_noise_prng_kernel(seed_ref, sigma_ref, x_ref, o_ref):
    # Decorrelate blocks (and cores, under "parallel") by folding the grid
    # position into the seed.
    pltpu.prng_seed(seed_ref[0] + pl.program_id(0))
    shape = x_ref.shape
    f0 = _bits_to_unit_float(pltpu.prng_random_bits(shape))
    f1 = _bits_to_unit_float(pltpu.prng_random_bits(shape))
    u1 = 2.0 - f0                 # (0, 1]  -> safe for log
    u2 = f1 - 1.0                 # [0, 1)
    # Box-Muller: log/sqrt/cos hit the EUP slot, free filler for a mem-bound op.
    n = jnp.sqrt(-2.0 * jnp.log(u1)) * jnp.cos(_TWO_PI * u2)
    x = x_ref[...].astype(jnp.float32)
    o_ref[...] = (x * (1.0 + sigma_ref[0] * n)).astype(o_ref.dtype)


def _gaussian_noise_hostnoise_kernel(sigma_ref, x_ref, n_ref, o_ref):
    # Fallback (non-TPU backends): noise streamed from HBM as a second operand.
    x = x_ref[...].astype(jnp.float32)
    n = n_ref[...].astype(jnp.float32)
    o_ref[...] = (x * (1.0 + sigma_ref[0] * n)).astype(o_ref.dtype)


def _as_lane_dense_2d(x):
    """Lane-dense 2-D view of x; copy-free unless numel % 1024 != 0.

    Returns (x2d, needs_slice).
    """
    total = math.prod(x.shape)
    if (x.ndim >= 2 and x.shape[-1] % 128 == 0
            and 8 * x.shape[-1] * 4 <= _TARGET_BLOCK_BYTES):
        # Fast path A: already lane-friendly; collapse leading dims (free reshape).
        return x.reshape(total // x.shape[-1], x.shape[-1]), False
    if total % _LANE == 0:
        # Fast path B: free flatten into a (rows, 1024) slab.
        return x.reshape(total // _LANE, _LANE), False
    # Fallback: pad the flat vector up to a whole 1024-lane row (only the ragged
    # tail, < 1024 elements, is synthetic; the pad/slice copies only hit here).
    rows = pl.cdiv(total, _LANE)
    xf = jnp.pad(x.reshape(-1), (0, rows * _LANE - total))
    return xf.reshape(rows, _LANE), True


def _pick_block_rows(rows, cols):
    budget = max(8, (_TARGET_BLOCK_BYTES // (cols * 4)) // 8 * 8)
    if rows % 8 == 0:
        return min(budget, rows)
    if rows <= budget:
        return rows          # single full-extent block (any row count allowed)
    return budget            # ragged last block; Pallas masks the edge stores


def gaussian_noise(x, seed, *, sigma=0.1, is_relative_detach=True,
                   training=True, in_kernel_rng=None):
    """Pallas TPU implementation of GaussianNoise.forward.

    `is_relative_detach` only changes gradient flow; the forward value is
    identical, so it is accepted for API parity only.
    """
    del is_relative_detach  # forward-pass value is unaffected
    if not training or sigma == 0:
        return x
    if in_kernel_rng is None:
        in_kernel_rng = jax.default_backend() == "tpu"

    orig_shape, orig_dtype = x.shape, x.dtype
    total = math.prod(orig_shape)

    x2d, needs_slice = _as_lane_dense_2d(x)
    rows, cols = x2d.shape
    block_rows = _pick_block_rows(rows, cols)
    grid = (pl.cdiv(rows, block_rows),)

    sigma_arr = jnp.asarray([sigma], dtype=jnp.float32)
    smem_spec = pl.BlockSpec(memory_space=pltpu.MemorySpace.SMEM)
    tile_spec = pl.BlockSpec((block_rows, cols), lambda i: (i, 0))
    cparams = pltpu.CompilerParams(
        dimension_semantics=("parallel",),
        vmem_limit_bytes=32 * 1024 * 1024,
    )
    # TODO(synk): on v7x, consider pltpu.CORE_PARALLEL (or an explicit core_map
    # split) to guarantee the grid is streamed by both TensorCores.

    if in_kernel_rng:
        seed_arr = jnp.asarray(seed, dtype=jnp.int32).reshape(1)
        out2d = pl.pallas_call(
            _gaussian_noise_prng_kernel,
            out_shape=jax.ShapeDtypeStruct(x2d.shape, x2d.dtype),
            grid=grid,
            in_specs=[smem_spec, smem_spec, tile_spec],
            out_specs=tile_spec,
            compiler_params=cparams,
        )(seed_arr, sigma_arr, x2d)
    else:
        noise2d = jax.random.normal(jax.random.PRNGKey(seed), x2d.shape,
                                    dtype=jnp.float32)
        out2d = pl.pallas_call(
            _gaussian_noise_hostnoise_kernel,
            out_shape=jax.ShapeDtypeStruct(x2d.shape, x2d.dtype),
            grid=grid,
            in_specs=[smem_spec, tile_spec, tile_spec],
            out_specs=tile_spec,
            compiler_params=cparams,
        )(sigma_arr, x2d, noise2d)

    out = out2d.reshape(-1)[:total] if needs_slice else out2d
    return out.reshape(orig_shape).astype(orig_dtype)


if __name__ == "__main__":
    key = jax.random.PRNGKey(0)
    x = jax.random.normal(key, (2, 4, 16, 16), dtype=jnp.float32)  # NCHW

    sigma = 0.1
    out = jax.block_until_ready(gaussian_noise(x, seed=42, sigma=sigma, training=True))

    # Shape/dtype preserved, values finite, input actually perturbed.
    assert out.shape == x.shape and out.dtype == x.dtype
    assert bool(jnp.all(jnp.isfinite(out)))
    assert float(jnp.max(jnp.abs(out - x))) > 0.0

    # Relative noise: out/x - 1 == sigma * N(0,1); its empirical std must be
    # ~sigma and mean ~0 over 2048 samples (mask near-zero x for conditioning).
    mask = jnp.abs(x) > 1e-3
    rel = jnp.where(mask, out / x - 1.0, 0.0)
    cnt = jnp.sum(mask)
    mean = jnp.sum(rel) / cnt
    std = jnp.sqrt(jnp.sum(jnp.where(mask, (rel - mean) ** 2, 0.0)) / cnt)
    assert abs(float(std) - sigma) < 0.02, float(std)
    assert abs(float(mean)) < 0.02, float(mean)

    # Ragged/odd-size fallback path (pad + slice) round-trips correctly.
    x_odd = jax.random.normal(jax.random.PRNGKey(1), (3, 5, 7), dtype=jnp.float32)
    out_odd = jax.block_until_ready(gaussian_noise(x_odd, seed=7, sigma=sigma))
    assert out_odd.shape == x_odd.shape and out_odd.dtype == x_odd.dtype
    assert bool(jnp.all(jnp.isfinite(out_odd)))
    assert float(jnp.max(jnp.abs(out_odd - x_odd))) > 0.0

    # Eval mode / sigma == 0 must be the identity.
    out_eval = jax.block_until_ready(gaussian_noise(x, seed=42, training=False))
    assert bool(jnp.all(out_eval == x))
    out_zero = jax.block_until_ready(gaussian_noise(x, seed=42, sigma=0.0, training=True))
    assert bool(jnp.all(out_zero == x))

    print("KERNEL_OK")
</pallas_src>

<mosaic_0001>
module attributes {stable_mosaic.version = 11 : i64} {
  func.func @_gaussian_noise_hostnoise_kernel(%arg0: i32, %arg1: memref<1xf32, #tpu.memory_space<smem>>, %arg2: memref<2x1024xf32, #tpu.memory_space<vmem>>, %arg3: memref<2x1024xf32, #tpu.memory_space<vmem>>, %arg4: memref<2x1024xf32, #tpu.memory_space<vmem>>) attributes {dimension_semantics = [#tpu.dimension_semantics<parallel>], iteration_bounds = array<i64: 1>, scalar_prefetch = 0 : i64, scratch_operands = 0 : i64, tpu.core_type = #tpu.core_type<tc>, window_params = [{transform_indices = @transform_0, window_bounds = array<i64: 1>}, {transform_indices = @transform_1, window_bounds = array<i64: 2, 1024>}, {transform_indices = @transform_2, window_bounds = array<i64: 2, 1024>}, {transform_indices = @transform_3, window_bounds = array<i64: 2, 1024>}]} {
    %c0 = arith.constant 0 : index
    %c0_0 = arith.constant 0 : index
    %0 = vector.load %arg2[%c0, %c0_0] : memref<2x1024xf32, #tpu.memory_space<vmem>>, vector<2x1024xf32>
    %c0_1 = arith.constant 0 : index
    %c0_2 = arith.constant 0 : index
    %1 = vector.load %arg3[%c0_1, %c0_2] : memref<2x1024xf32, #tpu.memory_space<vmem>>, vector<2x1024xf32>
    %c0_3 = arith.constant 0 : index
    %2 = memref.load %arg1[%c0_3] : memref<1xf32, #tpu.memory_space<smem>>
    %3 = vector.broadcast %2 : f32 to vector<2x1024xf32>
    %4 = arith.mulf %3, %1 : vector<2x1024xf32>
    %cst = arith.constant 1.000000e+00 : f32
    %5 = vector.broadcast %cst : f32 to vector<2x1024xf32>
    %6 = arith.addf %5, %4 : vector<2x1024xf32>
    %7 = arith.mulf %0, %6 : vector<2x1024xf32>
    %c0_4 = arith.constant 0 : index
    %c0_5 = arith.constant 0 : index
    %8 = vector.load %arg4[%c0_4, %c0_5] : memref<2x1024xf32, #tpu.memory_space<vmem>>, vector<2x1024xf32>
    tpu.vector_store %arg4[%c0_4, %c0_5], %7 {strides = array<i32>} : memref<2x1024xf32, #tpu.memory_space<vmem>>, vector<2x1024xf32>,
    return
  }
  func.func @transform_0(%arg0: i32) -> i32 {
    %c0_i32 = arith.constant 0 : i32
    %c0_i32_0 = arith.constant 0 : i32
    return %c0_i32 : i32
  }
  func.func @transform_1(%arg0: i32) -> (i32, i32) {
    %c0_i32 = arith.constant 0 : i32
    %c0_i32_0 = arith.constant 0 : i32
    return %arg0, %c0_i32 : i32, i32
  }
  func.func @transform_2(%arg0: i32) -> (i32, i32) {
    %c0_i32 = arith.constant 0 : i32
    %c0_i32_0 = arith.constant 0 : i32
    return %arg0, %c0_i32 : i32, i32
  }
  func.func @transform_3(%arg0: i32) -> (i32, i32) {
    %c0_i32 = arith.constant 0 : i32
    %c0_i32_0 = arith.constant 0 : i32
    return %arg0, %c0_i32 : i32, i32
  }
}

</mosaic_0001>

<bundles_post_ra>
// kernel: tpu_custom_call.1
= control target key start
LH: loop header
LB: loop body
LE: loop exit
PB: predicated region body
PF: predicated region fallthrough
CT: control target
= control target key end

     0   :  { %9 = vsyncpa [#allocation4], 0  ;;  %s207_s0 = inlined_call_operand.<no memory space> [shape: f32[1], index: 0, kind: input, shape index: {}]   ;;  %s208_s1 = inlined_call_operand.hbm [shape: f32[2,1024], index: 1, kind: input, shape index: {}]   ;;  %s209_s2 = inlined_call_operand.hbm [shape: f32[2,1024], index: 2, kind: input, shape index: {}]   ;;  %s210_s3 = inlined_call_operand.hbm [shape: f32[2,1024], index: 3, kind: output, shape index: {}]  }
   0x1   :  { %10 = vsyncpa [#allocation7], 0 }
   0x2   :  { %11 = vsyncpa [#allocation5], 0  ;;  %s145_s12 = smov [#allocation3]   ;;  %s146_s14 = smov [#allocation6]  }
   0x3   :  { %s20_s13 = sshll.u32 %s145_s12, 4  ;;  %s30_s15 = sshll.u32 %s146_s14, 4  ;;  %s21_s13 = int_to_ptr.vmem [resolvable:$true] %s20_s13  ;;  %s31_s15 = int_to_ptr.vmem [resolvable:$true] %s30_s15 }
   0x4   :  { %s73_s18 = scalar_lea.hbm %s208_s1, 256 }
   0x5   :  { %p74_p0 = scmp.ne.s32.totalorder %s208_s1, %s73_s18  ;;  %p77_p1 = scmp.lt.u32.totalorder %s73_s18, %s208_s1 }
   0x7   :  { %p79_p2 = pnand %p77_p1, %p74_p0 }
   0x9   :  { %82 = shalt.err (!%p79_p2)
}
   0xa   :  { %s83_s23 = scalar_lea.vmem %s21_s13, 256  ;;  %p88_p4 = scmp.lt.s32.totalorder %s21_s13, %s21_s13 }
   0xb   :  { %p84_p3 = scmp.ne.s32.totalorder %s21_s13, %s83_s23  ;;  %p89_p5 = scmp.lt.s32.totalorder %s83_s23, %s83_s23 }
   0xd   :  { %p90_p6 = por %p89_p5, %p88_p4 }
   0xf   :  { %p91_p7 = pnand %p90_p6, %p84_p3 }
  0x11   :  { %94 = shalt.err (!%p91_p7)
}
  0x12   :  { %23 = dma.hbm_to_vmem [thread:$0]  %s208_s1, 256, %s21_s13, [#allocation4]  }
  0x13   :  { %s95_s28 = scalar_lea.hbm %s209_s2, 256 }
  0x14   :  { %p96_p8 = scmp.ne.s32.totalorder %s209_s2, %s95_s28  ;;  %p99_p9 = scmp.lt.u32.totalorder %s95_s28, %s209_s2 }
  0x16   :  { %p101_p10 = pnand %p99_p9, %p96_p8 }
  0x18   :  { %104 = shalt.err (!%p101_p10)
}
  0x19   :  { %s105_s6 = scalar_lea.vmem %s31_s15, 256  ;;  %p110_p12 = scmp.lt.s32.totalorder %s31_s15, %s31_s15 }
  0x1a   :  { %p106_p11 = scmp.ne.s32.totalorder %s31_s15, %s105_s6  ;;  %p111_p13 = scmp.lt.s32.totalorder %s105_s6, %s105_s6 }
  0x1c   :  { %p112_p0 = por %p111_p13, %p110_p12 }
  0x1e   :  { %p113_p1 = pnand %p112_p0, %p106_p11 }
  0x20   :  { %116 = shalt.err (!%p113_p1)
}
  0x21   :  { %33 = dma.hbm_to_vmem [thread:$0]  %s209_s2, 256, %s31_s15, [#allocation7]  }
  0x22   :  { %139 = dma.done.wait [#allocation4], 256  }
  0x23   :  { %140 = vsyncadd [#allocation4], 4294967040 }
  0x24   :  { %141 = dma.done.wait [#allocation7], 256  }
  0x25   :  { %142 = vsyncadd [#allocation7], 4294967040  ;;  %v45_v0 = vstv %s207_s0  ;;  %v42_v1 = vld [vmem:[#allocation6] sm:$0xff]  ;;  %v43_v3 = vld [vmem:[#allocation6 + $0x8] sm:$0xff]  ;;  %s147_s10 = smov [#allocation8]  }
  0x26   :  { %v46_v2 = vmul.f32 %v45_v0, %v42_v1  ;;  %v40_v4 = vld [vmem:[#allocation3] sm:$0xff]  ;;  %v47_v5 = vmul.f32 %v45_v0, %v43_v3  ;;  %v41_v7 = vld [vmem:[#allocation3 + $0x8] sm:$0xff]  ;;  %s60_s11 = sshll.u32 %s147_s10, 4  ;;  %s61_s11 = int_to_ptr.vmem [resolvable:$true] %s60_s11 }
  0x27   :  { %s117_s2 = scalar_lea.vmem %s61_s11, 256  ;;  %p122_p3 = scmp.lt.s32.totalorder %s61_s11, %s61_s11 }
  0x28   :  { %v48_v6 = vadd.f32 1.0, %v46_v2  ;;  %v49_v8 = vadd.f32 1.0, %v47_v5  ;;  %p118_p2 = scmp.ne.s32.totalorder %s61_s11, %s117_s2  ;;  %p123_p4 = scmp.lt.s32.totalorder %s117_s2, %s117_s2 }
  0x2a   :  { %v50_v9 = vmul.f32 %v48_v6, %v40_v4  ;;  %v51_v10 = vmul.f32 %v49_v8, %v41_v7  ;;  %p124_p5 = por %p123_p4, %p122_p3 }
  0x2c   :  { %52 = vst [vmem:[#allocation8] sm:$0xff] %v50_v9  ;;  %53 = vst [vmem:[#allocation8 + $0x8] sm:$0xff] %v51_v10  ;;  %p125_p6 = pnand %p124_p5, %p118_p2 }
  0x2e   :  { %128 = shalt.err (!%p125_p6)
}
  0x2f   :  { %s129_s13 = scalar_lea.hbm %s210_s3, 256 }
  0x30   :  { %p130_p7 = scmp.ne.s32.totalorder %s210_s3, %s129_s13  ;;  %p133_p8 = scmp.lt.u32.totalorder %s129_s13, %s210_s3 }
  0x32   :  { %p135_p9 = pnand %p133_p8, %p130_p7 }
  0x34   :  { %138 = shalt.err (!%p135_p9)
}
  0x35   :  { %63 = dma.vmem_to_hbm [thread:$0]  %s61_s11, 256, %s210_s3, [#allocation5]  }
  0x36   :  { %143 = dma.done.wait [#allocation5], 256  }
  0x37   :  { %144 = vsyncadd [#allocation5], 4294967040 }
  0x38   :  { %67 = vsyncpa [#allocation4], 1 }
  0x39   :  { %68 = vsyncpa [#allocation7], 1 }
  0x3a   :  { %69 = vsyncpa [#allocation5], 1 }

</bundles_post_ra>
